<compile_context>
chip_gen: v5e
topology: v5e:2x2
jax: 0.10.0
libtpu: 0.0.40
codegen_flags: <defaults>
</compile_context>

<pallas_src>
import jax
import jax.numpy as jnp
import numpy as np
from jax.experimental import pallas as pl
from jax.experimental.pallas import tpu as pltpu


def _noise_injection_kernel(w_ref, noise_ref, img_ref, out_ref):
    """out = image + weight * noise  (noise broadcast over the channel axis).

    w_ref     : SMEM (1,)            scalar weight
    noise_ref : VMEM (1, Cn, H*W)    Cn == 1 (broadcast) or Cn == C
    img_ref   : VMEM (1, C,  H*W)
    out_ref   : VMEM (1, C,  H*W)
    """
    w = w_ref[0]
    out_ref[...] = (img_ref[...] + w * noise_ref[...]).astype(out_ref.dtype)


def noise_injection(image, weight, noise=None, *, key=None):
    """Pallas TPU implementation of NoiseInjection.forward (project=False).

    image  : (N, C, H, W) float32
    weight : scalar (or shape-(1,)) float32
    noise  : optional (N, 1, H, W) or (N, C, H, W) float32.  If None, standard
             normal noise of shape (N, 1, H, W) is drawn from `key`.
    """
    N, C, H, W = image.shape
    if noise is None:
        if key is None:
            raise ValueError("noise=None requires a PRNG key")
        # TODO(synk): the PyTorch module draws noise in-module with .normal_();
        # here it is drawn in the wrapper (jax.random.normal) and the fused
        # scale+add runs in the Pallas kernel.
        noise = jax.random.normal(key, (N, 1, H, W), image.dtype)

    Cn = noise.shape[1]
    HW = H * W

    # Lane-dense layout: spatial flattened onto the last (lane) axis.
    img_flat = image.reshape(N, C, HW)
    nz_flat = noise.reshape(N, Cn, HW)
    w = jnp.asarray(weight, jnp.float32).reshape(1)

    out = pl.pallas_call(
        _noise_injection_kernel,
        grid=(N,),
        in_specs=[
            pl.BlockSpec(memory_space=pltpu.MemorySpace.SMEM),        # weight
            pl.BlockSpec((1, Cn, HW), lambda n: (n, 0, 0)),           # noise
            pl.BlockSpec((1, C, HW), lambda n: (n, 0, 0)),            # image
        ],
        out_specs=pl.BlockSpec((1, C, HW), lambda n: (n, 0, 0)),
        out_shape=jax.ShapeDtypeStruct((N, C, HW), image.dtype),
        compiler_params=pltpu.CompilerParams(
            dimension_semantics=("parallel",)),
    )(w, nz_flat, img_flat)

    return out.reshape(N, C, H, W)


def ref_noise_injection(image, weight, noise):
    """Pure-JAX reference: image + weight * noise (broadcast over channels)."""
    return image + jnp.asarray(weight, jnp.float32) * noise


if __name__ == "__main__":
    N, C, H, W = 2, 4, 16, 16

    key = jax.random.PRNGKey(0)
    k_img, k_noise, k_noise2 = jax.random.split(key, 3)

    image = jax.random.normal(k_img, (N, C, H, W), jnp.float32)
    noise = jax.random.normal(k_noise, (N, 1, H, W), jnp.float32)
    weight = jnp.asarray([0.37], jnp.float32)  # nn.Parameter(torch.zeros(1)) init is 0; use nonzero to exercise the op

    # Path 1: explicit noise (matches `forward(image, noise=noise)`).
    out = noise_injection(image, weight, noise)
    out = jax.block_until_ready(out)
    ref = ref_noise_injection(image, weight, noise)
    np.testing.assert_allclose(np.asarray(out), np.asarray(ref),
                               rtol=1e-6, atol=1e-6)

    # Path 2: noise=None (module draws standard-normal noise itself).
    out2 = noise_injection(image, weight, None, key=k_noise2)
    out2 = jax.block_until_ready(out2)
    noise_drawn = jax.random.normal(k_noise2, (N, 1, H, W), jnp.float32)
    ref2 = ref_noise_injection(image, weight, noise_drawn)
    np.testing.assert_allclose(np.asarray(out2), np.asarray(ref2),
                               rtol=1e-6, atol=1e-6)

    print("KERNEL_OK")
</pallas_src>

<mosaic_0001>
module attributes {stable_mosaic.version = 11 : i64} {
  func.func @_noise_injection_kernel(%arg0: i32, %arg1: memref<1xf32, #tpu.memory_space<smem>>, %arg2: memref<1x1x256xf32, #tpu.memory_space<vmem>>, %arg3: memref<1x4x256xf32, #tpu.memory_space<vmem>>, %arg4: memref<1x4x256xf32, #tpu.memory_space<vmem>>) attributes {dimension_semantics = [#tpu.dimension_semantics<parallel>], iteration_bounds = array<i64: 2>, scalar_prefetch = 0 : i64, scratch_operands = 0 : i64, tpu.core_type = #tpu.core_type<tc>, window_params = [{transform_indices = @transform_0, window_bounds = array<i64: 1>}, {transform_indices = @transform_1, window_bounds = array<i64: 1, 1, 256>}, {transform_indices = @transform_2, window_bounds = array<i64: 1, 4, 256>}, {transform_indices = @transform_3, window_bounds = array<i64: 1, 4, 256>}]} {
    %c0 = arith.constant 0 : index
    %0 = memref.load %arg1[%c0] : memref<1xf32, #tpu.memory_space<smem>>
    %c0_0 = arith.constant 0 : index
    %c0_1 = arith.constant 0 : index
    %c0_2 = arith.constant 0 : index
    %1 = vector.load %arg3[%c0_0, %c0_1, %c0_2] : memref<1x4x256xf32, #tpu.memory_space<vmem>>, vector<1x4x256xf32>
    %c0_3 = arith.constant 0 : index
    %c0_4 = arith.constant 0 : index
    %c0_5 = arith.constant 0 : index
    %2 = vector.load %arg2[%c0_3, %c0_4, %c0_5] : memref<1x1x256xf32, #tpu.memory_space<vmem>>, vector<1x1x256xf32>
    %3 = vector.broadcast %0 : f32 to vector<1x1x256xf32>
    %4 = arith.mulf %3, %2 : vector<1x1x256xf32>
    %5 = vector.broadcast %4 : vector<1x1x256xf32> to vector<1x4x256xf32>
    %6 = arith.addf %1, %5 : vector<1x4x256xf32>
    %c0_6 = arith.constant 0 : index
    %c0_7 = arith.constant 0 : index
    %c0_8 = arith.constant 0 : index
    %7 = vector.load %arg4[%c0_6, %c0_7, %c0_8] : memref<1x4x256xf32, #tpu.memory_space<vmem>>, vector<1x4x256xf32>
    tpu.vector_store %arg4[%c0_6, %c0_7, %c0_8], %6 {strides = array<i32>} : memref<1x4x256xf32, #tpu.memory_space<vmem>>, vector<1x4x256xf32>,
    return
  }
  func.func @transform_0(%arg0: i32) -> i32 {
    %c0_i32 = arith.constant 0 : i32
    %c0_i32_0 = arith.constant 0 : i32
    return %c0_i32 : i32
  }
  func.func @transform_1(%arg0: i32) -> (i32, i32, i32) {
    %c0_i32 = arith.constant 0 : i32
    %c0_i32_0 = arith.constant 0 : i32
    %c0_i32_1 = arith.constant 0 : i32
    return %arg0, %c0_i32, %c0_i32_0 : i32, i32, i32
  }
  func.func @transform_2(%arg0: i32) -> (i32, i32, i32) {
    %c0_i32 = arith.constant 0 : i32
    %c0_i32_0 = arith.constant 0 : i32
    %c0_i32_1 = arith.constant 0 : i32
    return %arg0, %c0_i32, %c0_i32_0 : i32, i32, i32
  }
  func.func @transform_3(%arg0: i32) -> (i32, i32, i32) {
    %c0_i32 = arith.constant 0 : i32
    %c0_i32_0 = arith.constant 0 : i32
    %c0_i32_1 = arith.constant 0 : i32
    return %arg0, %c0_i32, %c0_i32_0 : i32, i32, i32
  }
}

</mosaic_0001>

<bundles_post_ra>
// kernel: tpu_custom_call.1
= control target key start
LH: loop header
LB: loop body
LE: loop exit
PB: predicated region body
PF: predicated region fallthrough
CT: control target
= control target key end

     0   :  { %s741_s0 = inlined_call_operand.<no memory space> [shape: f32[1], index: 0, kind: input, shape index: {}]   ;;  %s742_s1 = inlined_call_operand.hbm [shape: f32[2,1,256], index: 1, kind: input, shape index: {}]   ;;  %s743_s2 = inlined_call_operand.hbm [shape: f32[2,4,256], index: 2, kind: input, shape index: {}]   ;;  %s744_s3 = inlined_call_operand.hbm [shape: f32[2,4,256], index: 3, kind: output, shape index: {}]  }
   0x1   :  { %8 = sst [smem:[#allocation2]] %s741_s0 }
   0x2   :  { %9 = vsyncpa [#allocation4], 0 }
   0x3   :  { %11 = vsyncpa [#allocation4 + $0x1], 0 }
   0x4   :  { %12 = vsyncpa [#allocation7], 0 }
   0x5   :  { %14 = vsyncpa [#allocation7 + $0x1], 0 }
   0x6   :  { %15 = vsyncpa [#allocation5], 0 }
   0x7   :  { %17 = vsyncpa [#allocation5 + $0x1], 0  ;;  %s578_s14 = smov 0   ;;  %s580_s15 = smov 0  }
   0x8   :  { %s582_s16 = smov 0   ;;  %s584_s17 = smov 0  }
   0x9 LB: > { %s599_s0 = sadd.s32 4294967295, %s553_s17   ;;  %s353_s18 = sadd.s32 4294967294, %s553_s17   ;;  %s553_s17 = sphi %s584_s17, %s755_s17   ;;  %s549_s16 = sphi %s582_s16, %s754_s16   ;;  %s545_s15 = sphi %s580_s15, %s753_s15   ;;  %s541_s14 = sphi %s578_s14, %s752_s14  }
   0xa   : > { %s603_s19 = sadd.s32 1, %s553_s17   ;;  %s51_s20 = sadd.s32 1, %s549_s16 }
   0xb   : > { %s48_s21 = ssub.s32 %s553_s17, %s603_s19  ;;  %p58_p0 = scmp.ne.s32.totalorder %s549_s16, %s545_s15 }
   0xc   : > { %p49_p1 = scmp.eq.s32.totalorder %s48_s21, 0  ;;  %p59_p2 = scmp.eq.s32.totalorder %s553_s17, 0 }
   0xd   : > { %p64_p3 = scmp.ne.s32.totalorder %s545_s15, %s541_s14  ;;  %p65_p4 = scmp.eq.s32.totalorder %s599_s0, 0 }
   0xe   : > { %s615_s22 = scalar_select %p49_p1, %s549_s16, %s51_s20  }
   0xf   : > { %p617_p5 = por %p59_p2, %p58_p0  ;;  %p621_p6 = por %p65_p4, %p64_p3 }
  0x10   : > { %p114_p7 = scmp.eq.s32.totalorder %s599_s0, 1  ;;  %p120_p8 = scmp.eq.s32.totalorder %s353_s18, 1 }
  0x11   : > { %p389_p10 = scmp.lt.s32.totalorder %s553_s17, 2  ;;  %s637_s27 = sand.u32 1, %s549_s16  }
  0x12   : > { %p628_p11 = por %p114_p7, %p58_p0  ;;  %p632_p12 = por %p120_p8, %p64_p3 }
  0x13   : > { %s357_s28 = sshll.u32 %s553_s17, 1  ;;  %s356_s29 = sshll.u32 %s637_s27, 1 }
  0x14   : > { %s151_s5 = scalar_lea.hbm %s742_s1, %s357_s28  ;;  %s147_s7 = scalar_lea.vmem [#allocation3], %s356_s29 }
  0x15   : > { %s153_s6 = sshll.u32 %s151_s5, 4  ;;  %s155_s8 = sshll.u32 %s147_s7, 4  ;;  %s154_s6 = int_to_ptr.hbm [resolvable:$true] %s153_s6  ;;  %s156_s8 = int_to_ptr.vmem [resolvable:$true] %s155_s8 }
  0x16   : > { %p646_p13 = pnand %p389_p10, %p617_p5  ;;  %p361_p0 = scmp.ge.s32.totalorder %s553_s17, 1 }
  0x17   : > { %p180_p1 = scmp.lt.s32.totalorder %s553_s17, 3  ;;  %s358_s10 = sshll.u32 %s637_s27, 3 }
  0x18   : > { %s144_s11 = scalar_lea.sflag [#allocation4], %s637_s27  ;;  %s423_s12 = sshra.s32 %s154_s6, 4  ;;  %s424_s12 = int_to_ptr.hbm [resolvable:$true] %s423_s12 }
  0x19   : > { %s425_s13 = scalar_lea.hbm %s424_s12, 2  ;;  %p427_p3 = pneg %p646_p13 }
  0x1a   : > { %p426_p2 = scmp.ne.s32.totalorder %s424_s12, %s425_s13  ;;  %s430_s21 = scalar_lea.hbm %s742_s1, 4 }
  0x1b   : > { %p431_p5 = scmp.lt.s32.totalorder %s424_s12, %s742_s1  ;;  %p432_p8 = scmp.lt.s32.totalorder %s430_s21, %s425_s13 }
  0x1c   : > { %p428_p4 = pnand %p427_p3, %p426_p2 }
  0x1d   : > { %p433_p10 = por %p432_p8, %p431_p5 }
  0x1e   : > { %p429_p7 = pneg %p428_p4 }
  0x20   : > { %p434_p9 = pnand %p433_p10, %p429_p7 }
  0x22   : > { %437 = shalt.err (!%p434_p9)
}
  0x23   : > { %381 = dma.hbm_to_vmem [thread:$0]  (!%p646_p13), %s154_s6, 32, %s156_s8, %s144_s11  }
  0x24   : > { %p671_p2 = pnand %p361_p0, %p180_p1  ;;  %s370_s30 = sshll.u32 %s553_s17, 3 }
  0x25   : > { %s166_s4 = scalar_lea.vmem [#allocation6], %s358_s10  ;;  %s171_s13 = scalar_lea.hbm %s743_s2, %s370_s30 }
  0x26   : > { %s175_s5 = sshll.u32 %s166_s4, 4  ;;  %s173_s18 = sshll.u32 %s171_s13, 4  ;;  %s176_s5 = int_to_ptr.vmem [resolvable:$true] %s175_s5  ;;  %s174_s18 = int_to_ptr.hbm [resolvable:$true] %s173_s18 }
  0x27   : > { %s163_s20 = scalar_lea.sflag [#allocation7], %s637_s27  ;;  %s453_s21 = sshra.s32 %s174_s18, 4  ;;  %s454_s21 = int_to_ptr.hbm [resolvable:$true] %s453_s21 }
  0x28   : > { %s455_s6 = scalar_lea.hbm %s454_s21, 8  ;;  %s460_s10 = scalar_lea.hbm %s743_s2, 16 }
  0x29   : > { %p456_p9 = scmp.ne.s32.totalorder %s454_s21, %s455_s6  ;;  %p461_p4 = scmp.lt.s32.totalorder %s454_s21, %s743_s2 }
  0x2a   : > { %p462_p7 = scmp.lt.s32.totalorder %s460_s10, %s455_s6 }
  0x2b   : > { %p458_p0 = pnand %p456_p9, %p427_p3 }
  0x2c   : > { %p463_p5 = por %p462_p7, %p461_p4 }
  0x2d   : > { %p459_p1 = pneg %p458_p0 }
  0x2f   : > { %p464_p8 = pnand %p463_p5, %p459_p1 }
  0x31   : > { %467 = shalt.err (!%p464_p8)
}
  0x32   : > { %384 = dma.hbm_to_vmem [thread:$0]  (!%p646_p13), %s174_s18, 128, %s176_s5, %s163_s20  }
  0x33   : > { %184 = sbr.rel (%p671_p2) target bundleno = 79 (0x4f), region = 32  ;;  %s694_s27 = sand.u32 (!%p671_p2), 1, %s545_s15  }
  0x34   : > { %s362_s30 = sshll.u32 (!%p671_p2), %s694_s27, 1  ;;  %s187_s4 = scalar_lea.sflag (!%p671_p2), [#allocation4], %s694_s27 }
  0x35   : > { %s190_s7 = scalar_lea.vmem (!%p671_p2), [#allocation3], %s362_s30 }
  0x38   : > { %528 = dma.done.wait (%p621_p6), %s187_s4, 32  }
  0x39   : > { %530 = vsyncadd (%p621_p6), %s187_s4, 4294967264  ;;  %s363_s9 = sshll.u32 %s694_s27, 3  ;;  %s197_s29 = scalar_lea.sflag [#allocation7], %s694_s27 }
  0x3a   : > { %s200_s5 = scalar_lea.vmem [#allocation6], %s363_s9 }
  0x3b   : > { %532 = dma.done.wait (%p621_p6), %s197_s29, 128  }
  0x3c   : > { %534 = vsyncadd (%p621_p6), %s197_s29, 4294967168  ;;  %s229_s12 = sld [smem:[#allocation2]]  ;;  %s371_s13 = sshll.u32 %s599_s0, 3  ;;  %v231_v0 = vld [vmem:[%s190_s7] sm:$0x3]  ;;  %vm238_vm0 = vcmask 1043456  }
  0x3d   : > { %s255_s21 = scalar_lea.hbm %s744_s3, %s371_s13  ;;  %v230_v5 = vld [vmem:[%s200_s5] sm:$0xff]  ;;  %s228_s6 = scalar_lea.vmem [#allocation8], %s363_s9 }
  0x3e   : > { %s257_s24 = sshll.u32 %s228_s6, 4  ;;  %s259_s8 = sshll.u32 %s255_s21, 4  ;;  %s258_s24 = int_to_ptr.vmem [resolvable:$true] %s257_s24  ;;  %s260_s8 = int_to_ptr.hbm [resolvable:$true] %s259_s8 }
  0x3f   : > { %s244_s0 = scalar_lea.sflag [#allocation5], %s694_s27  ;;  %s497_s11 = sshra.s32 %s260_s8, 4  ;;  %s498_s11 = int_to_ptr.hbm [resolvable:$true] %s497_s11 }
  0x40   : > { %s499_s10 = scalar_lea.hbm %s498_s11, 8  ;;  %s503_s30 = scalar_lea.hbm %s744_s3, 16 }
  0x41   : > { %p500_p6 = scmp.ne.s32.totalorder %s498_s11, %s499_s10  ;;  %p504_p10 = scmp.lt.s32.totalorder %s498_s11, %s744_s3 }
  0x42   : > { %v232_v1 = vstv %s229_s12  ;;  %p505_p2 = scmp.lt.s32.totalorder %s503_s30, %s499_s10 }
  0x43   : > { %v233_v2 = vmul.f32 %v232_v1, %v231_v0  ;;  %p501_p13 = pnand %p500_p6, %p628_p11 }
  0x44   : > { %p506_p9 = por %p505_p2, %p504_p10 }
  0x45   : > { %v235_v3 = vperm.slane %v233_v2, 0  ;;  %v236_v4 = vperm.slane %v233_v2, 1  ;;  %p502_p3 = pneg %p501_p13 }
  0x47   : > { %v237_v6 = vrot.slane %v236_v4, 4  ;;  %p507_p0 = pnand %p506_p9, %p502_p3 }
  0x49   : > { %v239_v7 = vsel %vm238_vm0, %v235_v3, %v237_v6 }
  0x4a   : > { %v241_v8 = vadd.f32 %v239_v7, %v230_v5 }
  0x4c   : > { %242 = vst [vmem:[%s228_s6] sm:$0xff] %v241_v8 }
  0x4d   : > { %510 = shalt.err (!%p507_p0)
}
  0x4e   : > { %376 = dma.vmem_to_hbm [thread:$0]  (%p628_p11), %s258_s24, 128, %s260_s8, %s244_s0  }
  0x4f PF: > { %s271_s27 = sand.u32 1, %s541_s14   ;;  %p751_p1 = scmp.ge.s32.totalorder %s553_s17, 2 }
  0x50   : > { %s272_s9 = scalar_lea.sflag [#allocation5], %s271_s27 }
  0x51   : > { %p386_p4 = pnand %p751_p1, %p632_p12 }
  0x53   : > { %p387_p7 = pneg %p386_p4 }
  0x55   : > { %536 = dma.done.wait (%p387_p7), %s272_s9, 128  }
  0x56   : > { %538 = vsyncadd (%p387_p7), %s272_s9, 4294967168  ;;  %p20_p5 = scmp.ge.s32.totalorder %s603_s19, 4   ;;  %s752_s14 = smov %s545_s15 }
  0x57   : > { %s753_s15 = smov %s549_s16  ;;  %s754_s16 = smov %s615_s22 }
  0x58   : > { %s755_s17 = smov %s603_s19  ;;  %22 = sbr.rel (!%p20_p5) target bundleno = 9 (0x9), region = 90 }
  0x5d   :  { %278 = vsyncpa [#allocation4], 1 }
  0x5e   :  { %280 = vsyncpa [#allocation4 + $0x1], 1 }
  0x5f   :  { %281 = vsyncpa [#allocation7], 1 }
  0x60   :  { %283 = vsyncpa [#allocation7 + $0x1], 1 }
  0x61   :  { %284 = vsyncpa [#allocation5], 1 }
  0x62   :  { %286 = vsyncpa [#allocation5 + $0x1], 1 }

</bundles_post_ra>
